<compile_context>
chip_gen: v7x
topology: tpu7x:2x2x1
jax: 0.10.0
libtpu: 0.0.40
codegen_flags: <defaults>
</compile_context>

<pallas_src>
import functools
from typing import NamedTuple

import jax
import jax.numpy as jnp
from jax import lax
from jax.experimental import pallas as pl
from jax.experimental.pallas import tpu as pltpu


class BlockCfg(NamedTuple):
    in_channels: int
    out_channels: int
    kernel_size: int
    stride: int          # effective stride (= stride if downsample else 1)
    groups: int
    downsample: bool
    use_bn: bool
    is_first_block: bool


def _same_pad(length, stride, kernel_size):
    out_dim = (length + stride - 1) // stride
    p = max(0, (out_dim - 1) * stride + kernel_size - length)
    return p // 2, p - p // 2, out_dim


# ----------------------------- Pallas kernel --------------------------------
def _basic_block_kernel(x_ref, tl_ref, bn1s_ref, bn1b_ref, w1_ref, pc1s_ref,
                        pc1b_ref, w2_ref, b2_ref, o_ref, band1_ref, band2_ref,
                        *, cfg, Bt, L_out, taps1, phase_valid, pad2_left, mp_taps):
    C_in, C_out, K = cfg.in_channels, cfg.out_channels, cfg.kernel_size
    s = max(cfg.stride, 1)
    N = Bt * L_out                        # lane width: batch packed into lanes
    f32 = jnp.float32
    cdt = w1_ref.dtype                    # MXU compute dtype (bf16 or f32)

    x_blk = x_ref[0]                      # (s*C_in, N) f32, phase-major rows
    t_lane = tl_ref[...]                  # (1, N) int32: lane position mod L_out

    def lane_shift(v, q):
        # out[:, j] = v[:, (j + q) mod N]; wrapped lanes are masked by window().
        # (2-slice form of jnp.roll(v, -q); lowers to an XLU lane rotation.)
        qm = q % N
        if qm == 0:
            return v
        return jnp.concatenate([v[:, qm:], v[:, :qm]], axis=1)

    def window(v, q, valid_len):
        # SAME-pad window: out[:, t] = v[:, t+q] if 0 <= t+q < valid_len else 0
        lo, hi = max(0, -q), min(L_out, valid_len - q)
        if hi <= lo:
            return jnp.zeros_like(v)
        shifted = lane_shift(v, q)
        if lo <= 0 and hi >= L_out:
            return shifted
        return jnp.where((t_lane >= lo) & (t_lane < hi), shifted, 0.0)

    # ---- pre-activation (BN1 + ReLU) per used phase; dropout = identity (eval) ----
    h_phase = {}
    for r in sorted({rk for rk, _ in taps1}):
        xr = x_blk[r * C_in:(r + 1) * C_in, :]
        if cfg.is_first_block:
            hr = xr
        else:
            hr = xr * bn1s_ref[...] + bn1b_ref[...] if cfg.use_bn else xr
            hr = jnp.maximum(hr, 0.0)
        h_phase[r] = hr
    # TODO(synk): nn.Dropout training-mode random masking not implemented (eval = identity).

    # ---- conv1: im2col band (K*C_in, N) in scratch, ONE fused MXU contraction ----
    for k in range(K):
        rk, qk = taps1[k]
        band1_ref[k * C_in:(k + 1) * C_in, :] = window(h_phase[rk], qk, phase_valid[rk])
    acc1 = jnp.dot(w1_ref[...], band1_ref[...].astype(cdt),
                   preferred_element_type=f32)

    # BN2 affine (conv1 bias folded in) + ReLU; dropout = identity (eval)
    h2 = jnp.maximum(acc1 * pc1s_ref[...] + pc1b_ref[...], 0.0)

    # ---- conv2: im2col from h2 via lane shifts (no padded-scratch round trip) ----
    for k in range(K):
        band2_ref[k * C_out:(k + 1) * C_out, :] = window(h2, k - pad2_left, L_out)
    acc2 = jnp.dot(w2_ref[...], band2_ref[...].astype(cdt),
                   preferred_element_type=f32)
    acc2 = acc2 + b2_ref[...]

    # ---- identity path: SAME max-pool (zero-padded, as the module's F.pad) ----
    if cfg.downsample and s > 1:
        ident = None
        for (rm, qm) in mp_taps:
            v = window(x_blk[rm * C_in:(rm + 1) * C_in, :], qm, phase_valid[rm])
            ident = v if ident is None else jnp.maximum(ident, v)
    else:
        ident = x_blk[0:C_in, :]

    # ---- residual add with channel zero-pad: add into matching sublane rows ----
    if C_out == C_in:
        o_ref[0] = acc2 + ident
    else:
        ch1 = (C_out - C_in) // 2
        if ch1 > 0:
            o_ref[0, 0:ch1, :] = acc2[0:ch1, :]
        o_ref[0, ch1:ch1 + C_in, :] = acc2[ch1:ch1 + C_in, :] + ident
        if ch1 + C_in < C_out:
            o_ref[0, ch1 + C_in:C_out, :] = acc2[ch1 + C_in:C_out, :]


# ------------------------------- wrapper -------------------------------------
def basic_block_forward(x_ncl, params, cfg: BlockCfg, *, batch_tile=1,
                        compute_dtype=jnp.bfloat16):
    """bf16 MXU compute (f32 accumulation) by default — ~2x MXU throughput on
    v5e/v6e/v7x.  Pass compute_dtype=jnp.float32 for bit-tight comparisons."""
    B, C_in, L = x_ncl.shape
    assert C_in == cfg.in_channels
    assert B % batch_tile == 0, "batch must be divisible by batch_tile"
    C_out, K = cfg.out_channels, cfg.kernel_size
    s, groups = max(cfg.stride, 1), cfg.groups
    Bt = batch_tile

    pad1_left, _pad1_right, L_out = _same_pad(L, s, K)
    N = Bt * L_out

    # Polyphase taps: padded position t*s + k - pad_left lives in phase r_k at
    # column t + q_k, with (r_k, q_k) = ((k - pad_left) % s, (k - pad_left) // s).
    def phase_taps(num_taps, pad_left):
        return tuple(((k - pad_left) % s, (k - pad_left) // s) for k in range(num_taps))

    taps1 = phase_taps(K, pad1_left)
    phase_valid = tuple(max(0, min(L_out, -(-(L - r) // s))) for r in range(s))
    pad2_left = (K - 1) // 2
    mp_left = (s - 1) // 2
    mp_taps = phase_taps(s, mp_left)

    # ---- glue: polyphase split + pack batch_tile into the lane axis ----
    # x_blk[g, r*C_in + c, bi*L_out + t] = x[g*Bt + bi, c, t*s + r]  (0 beyond L)
    # (For s == 1 and batch_tile == 1 this is a pure reshape — no extra HBM pass.)
    x_f = x_ncl.astype(jnp.float32)
    if L_out * s > L:
        x_f = jnp.pad(x_f, ((0, 0), (0, 0), (0, L_out * s - L)))
    x_ph = x_f.reshape(B, C_in, L_out, s).transpose(0, 3, 1, 2)        # (B,s,C_in,L_out)
    x_blk = (x_ph.reshape(B // Bt, Bt, s, C_in, L_out)
             .transpose(0, 2, 3, 1, 4)
             .reshape(B // Bt, s * C_in, N))

    # Lane position within each batch segment (built host-side; used for halo masks).
    t_lane = jnp.tile(jnp.arange(L_out, dtype=jnp.int32), (Bt,)).reshape(1, N)

    # ---- glue: fused tap weights, flattened to a (C_out, K*C) contraction ----
    # TODO(synk): block-diagonal grouped weights inflate MXU FLOPs by `groups`x;
    # loop over groups (or add a grid axis) for real grouped channel counts.
    def flat_tap_weights(w, cin_total):
        C_o, cin_g, Kk = w.shape
        cout_g = C_o // groups
        wf = jnp.zeros((C_o, Kk, cin_total), jnp.float32)
        for g in range(groups):
            blk = jnp.transpose(w[g * cout_g:(g + 1) * cout_g], (0, 2, 1))  # (cout_g,K,cin_g)
            wf = wf.at[g * cout_g:(g + 1) * cout_g, :,
                       g * cin_g:(g + 1) * cin_g].set(blk)
        return wf.reshape(C_o, Kk * cin_total).astype(compute_dtype)

    w1f = flat_tap_weights(params["w1"].astype(jnp.float32), C_in)
    w2f = flat_tap_weights(params["w2"].astype(jnp.float32), C_out)

    bn1s = params["bn1_scale"].reshape(C_in, 1).astype(jnp.float32)
    bn1b = params["bn1_bias"].reshape(C_in, 1).astype(jnp.float32)
    b1 = params["b1"].reshape(C_out, 1).astype(jnp.float32)
    b2 = params["b2"].reshape(C_out, 1).astype(jnp.float32)
    if cfg.use_bn:
        bn2s = params["bn2_scale"].reshape(C_out, 1).astype(jnp.float32)
        bn2b = params["bn2_bias"].reshape(C_out, 1).astype(jnp.float32)
        pc1s, pc1b = bn2s, bn2b + bn2s * b1          # fold conv1 bias into BN2 affine
    else:
        pc1s, pc1b = jnp.ones((C_out, 1), jnp.float32), b1

    kernel = functools.partial(
        _basic_block_kernel, cfg=cfg, Bt=Bt, L_out=L_out, taps1=taps1,
        phase_valid=phase_valid, pad2_left=pad2_left, mp_taps=mp_taps)

    def fixed(shape):
        # Grid-invariant parameter blocks.  TODO(synk): single-buffer these
        # (pipeline_mode=pl.Buffered(1)) once K*C_out*C_in weights get large
        # enough to matter inside v7x's 64 MiB VMEM.
        return pl.BlockSpec(shape, lambda g: (0,) * len(shape))

    # TODO(synk): for very large L, add a length-tiling grid axis with a (K-1)
    # halo and budget VMEM per generation (v7x: 64 MiB; set vmem_limit_bytes).
    out_blk = pl.pallas_call(
        kernel,
        out_shape=jax.ShapeDtypeStruct((B // Bt, C_out, N), jnp.float32),
        grid=(B // Bt,),
        in_specs=[
            pl.BlockSpec((1, s * C_in, N), lambda g: (g, 0, 0)),      # packed input
            fixed((1, N)),                                            # lane positions
            fixed((C_in, 1)), fixed((C_in, 1)),                       # bn1 scale/bias
            fixed((C_out, K * C_in)),                                 # w1 (fused taps)
            fixed((C_out, 1)), fixed((C_out, 1)),                     # folded BN2 affine
            fixed((C_out, K * C_out)),                                # w2 (fused taps)
            fixed((C_out, 1)),                                        # conv2 bias
        ],
        out_specs=pl.BlockSpec((1, C_out, N), lambda g: (g, 0, 0)),
        scratch_shapes=[pltpu.VMEM((K * C_in, N), jnp.float32),       # conv1 im2col band
                        pltpu.VMEM((K * C_out, N), jnp.float32)],     # conv2 im2col band
        compiler_params=pltpu.CompilerParams(dimension_semantics=("parallel",)),
    )(x_blk, t_lane, bn1s, bn1b, w1f, pc1s, pc1b, w2f, b2)

    # Unpack lanes back to (B, C_out, L_out).
    out = (out_blk.reshape(B // Bt, C_out, Bt, L_out)
           .transpose(0, 2, 1, 3).reshape(B, C_out, L_out))
    return out


# --------------------------- parameters (synthetic) ---------------------------
def init_params(key, cfg: BlockCfg):
    C_in, C_out, K, groups = cfg.in_channels, cfg.out_channels, cfg.kernel_size, cfg.groups
    k1, k2, k3, k4 = jax.random.split(key, 4)
    eps = 1e-5

    def bn_fold(C, base):
        gamma = 1.0 + 0.10 * jnp.arange(C, dtype=jnp.float32)
        beta = 0.05 * jnp.arange(C, dtype=jnp.float32) - base
        rmean = 0.02 * jnp.arange(C, dtype=jnp.float32)
        rvar = 1.0 + 0.03 * jnp.arange(C, dtype=jnp.float32)
        scale = gamma / jnp.sqrt(rvar + eps)
        bias = beta - rmean * scale
        return scale, bias

    bn1_scale, bn1_bias = bn_fold(C_in, 0.10)
    bn2_scale, bn2_bias = bn_fold(C_out, 0.05)

    w1 = 0.1 * jax.random.normal(k1, (C_out, C_in // groups, K), dtype=jnp.float32)
    b1 = 0.01 * jax.random.normal(k2, (C_out,), dtype=jnp.float32)
    w2 = 0.1 * jax.random.normal(k3, (C_out, C_out // groups, K), dtype=jnp.float32)
    b2 = 0.01 * jax.random.normal(k4, (C_out,), dtype=jnp.float32)

    return dict(bn1_scale=bn1_scale, bn1_bias=bn1_bias,
                bn2_scale=bn2_scale, bn2_bias=bn2_bias,
                w1=w1, b1=b1, w2=w2, b2=b2)


# ------------------------------ JAX reference ---------------------------------
def _conv1d_same_ref(x, w, b, stride, groups):
    L = x.shape[-1]
    p_l, p_r, _ = _same_pad(L, stride, w.shape[-1])
    y = lax.conv_general_dilated(x, w, (stride,), [(p_l, p_r)],
                                 dimension_numbers=("NCH", "OIH", "NCH"),
                                 feature_group_count=groups)
    return y + b[None, :, None]


def _maxpool_same_ref(x, k):
    if k <= 1:
        return x
    p_l = (k - 1) // 2
    p_r = (k - 1) - p_l
    xp = jnp.pad(x, ((0, 0), (0, 0), (p_l, p_r)))        # module uses F.pad with 0
    return lax.reduce_window(xp, -jnp.inf, lax.max, (1, 1, k), (1, 1, k), "VALID")


def ref_forward(x, params, cfg: BlockCfg):
    C_in, C_out = cfg.in_channels, cfg.out_channels
    out = x
    if not cfg.is_first_block:
        if cfg.use_bn:
            out = out * params["bn1_scale"][None, :, None] + params["bn1_bias"][None, :, None]
        out = jnp.maximum(out, 0.0)
    out = _conv1d_same_ref(out, params["w1"], params["b1"], cfg.stride, cfg.groups)
    if cfg.use_bn:
        out = out * params["bn2_scale"][None, :, None] + params["bn2_bias"][None, :, None]
    out = jnp.maximum(out, 0.0)
    out = _conv1d_same_ref(out, params["w2"], params["b2"], 1, cfg.groups)
    identity = x
    if cfg.downsample:
        identity = _maxpool_same_ref(identity, cfg.stride)
    if C_out != C_in:
        ch1 = (C_out - C_in) // 2
        ch2 = C_out - C_in - ch1
        identity = jnp.pad(identity, ((0, 0), (ch1, ch2), (0, 0)))
    return out + identity


# ---------------------------------- main --------------------------------------
if __name__ == "__main__":
    key = jax.random.PRNGKey(0)
    kx_a, kp_a, kx_b, kp_b = jax.random.split(key, 4)

    # Config A: downsampling block (stride 2, max-pool identity, channel pad).
    cfg_a = BlockCfg(in_channels=4, out_channels=8, kernel_size=3, stride=2,
                     groups=1, downsample=True, use_bn=True, is_first_block=False)
    x_a = jax.random.normal(kx_a, (2, cfg_a.in_channels, 16), dtype=jnp.float32)  # NCL
    params_a = init_params(kp_a, cfg_a)
    ref_a = ref_forward(x_a, params_a, cfg_a)

    # f32 MXU path, batch_tile=1 (keeps grid extent 2 -> both v7x TCs busy): tight check.
    out_a32 = jax.block_until_ready(
        basic_block_forward(x_a, params_a, cfg_a, batch_tile=1,
                            compute_dtype=jnp.float32))
    assert out_a32.shape == ref_a.shape, (out_a32.shape, ref_a.shape)
    if not bool(jnp.allclose(out_a32, ref_a, atol=1e-4, rtol=1e-4)):
        raise AssertionError("f32 kernel output does not match JAX reference")

    # Default bf16 MXU path with batch packed into the lane axis (lane-dense stores).
    out_a16 = jax.block_until_ready(
        basic_block_forward(x_a, params_a, cfg_a, batch_tile=2))
    if not bool(jnp.allclose(out_a16, ref_a, atol=3e-2, rtol=3e-2)):
        raise AssertionError("bf16 kernel output does not match JAX reference")

    # Config B: stride-1 residual block with grouped convs (left-halo taps, no pool).
    cfg_b = BlockCfg(in_channels=4, out_channels=8, kernel_size=3, stride=1,
                     groups=2, downsample=False, use_bn=True, is_first_block=False)
    x_b = jax.random.normal(kx_b, (2, cfg_b.in_channels, 16), dtype=jnp.float32)
    params_b = init_params(kp_b, cfg_b)
    ref_b = ref_forward(x_b, params_b, cfg_b)
    out_b = jax.block_until_ready(
        basic_block_forward(x_b, params_b, cfg_b, batch_tile=2,
                            compute_dtype=jnp.float32))
    if not bool(jnp.allclose(out_b, ref_b, atol=1e-4, rtol=1e-4)):
        raise AssertionError("grouped stride-1 kernel output does not match JAX reference")

    print("KERNEL_OK")
</pallas_src>

<mosaic_0001>
module attributes {stable_mosaic.version = 11 : i64} {
  func.func @_basic_block_kernel(%arg0: i32, %arg1: memref<1x8x8xf32, #tpu.memory_space<vmem>>, %arg2: memref<1x8xi32, #tpu.memory_space<vmem>>, %arg3: memref<4x1xf32, #tpu.memory_space<vmem>>, %arg4: memref<4x1xf32, #tpu.memory_space<vmem>>, %arg5: memref<8x12xf32, #tpu.memory_space<vmem>>, %arg6: memref<8x1xf32, #tpu.memory_space<vmem>>, %arg7: memref<8x1xf32, #tpu.memory_space<vmem>>, %arg8: memref<8x24xf32, #tpu.memory_space<vmem>>, %arg9: memref<8x1xf32, #tpu.memory_space<vmem>>, %arg10: memref<1x8x8xf32, #tpu.memory_space<vmem>>, %arg11: memref<12x8xf32, #tpu.memory_space<vmem>>, %arg12: memref<24x8xf32, #tpu.memory_space<vmem>>) attributes {dimension_semantics = [#tpu.dimension_semantics<parallel>], iteration_bounds = array<i64: 2>, scalar_prefetch = 0 : i64, scratch_operands = 2 : i64, tpu.core_type = #tpu.core_type<tc>, window_params = [{transform_indices = @transform_0, window_bounds = array<i64: 1, 8, 8>}, {pipeline_mode = #tpu.pipeline_mode<synchronous>, transform_indices = @transform_1, window_bounds = array<i64: 1, 8>}, {pipeline_mode = #tpu.pipeline_mode<synchronous>, transform_indices = @transform_2, window_bounds = array<i64: 4, 1>}, {pipeline_mode = #tpu.pipeline_mode<synchronous>, transform_indices = @transform_3, window_bounds = array<i64: 4, 1>}, {pipeline_mode = #tpu.pipeline_mode<synchronous>, transform_indices = @transform_4, window_bounds = array<i64: 8, 12>}, {pipeline_mode = #tpu.pipeline_mode<synchronous>, transform_indices = @transform_5, window_bounds = array<i64: 8, 1>}, {pipeline_mode = #tpu.pipeline_mode<synchronous>, transform_indices = @transform_6, window_bounds = array<i64: 8, 1>}, {pipeline_mode = #tpu.pipeline_mode<synchronous>, transform_indices = @transform_7, window_bounds = array<i64: 8, 24>}, {pipeline_mode = #tpu.pipeline_mode<synchronous>, transform_indices = @transform_8, window_bounds = array<i64: 8, 1>}, {transform_indices = @transform_9, window_bounds = array<i64: 1, 8, 8>}]} {
    %c0 = arith.constant 0 : index
    %c0_0 = arith.constant 0 : index
    %c0_1 = arith.constant 0 : index
    %0 = vector.load %arg1[%c0, %c0_0, %c0_1] : memref<1x8x8xf32, #tpu.memory_space<vmem>>, vector<1x8x8xf32>
    %1 = vector.shape_cast %0 : vector<1x8x8xf32> to vector<8x8xf32>
    %c0_2 = arith.constant 0 : index
    %c0_3 = arith.constant 0 : index
    %2 = vector.load %arg2[%c0_2, %c0_3] : memref<1x8xi32, #tpu.memory_space<vmem>>, vector<1x8xi32>
    %3 = vector.extract_strided_slice %1 {offsets = [0, 0], sizes = [4, 8], strides = [1, 1]} : vector<8x8xf32> to vector<4x8xf32>
    %c0_4 = arith.constant 0 : index
    %c0_5 = arith.constant 0 : index
    %4 = vector.load %arg3[%c0_4, %c0_5] : memref<4x1xf32, #tpu.memory_space<vmem>>, vector<4x1xf32>
    %5 = vector.broadcast %4 : vector<4x1xf32> to vector<4x8xf32>
    %6 = arith.mulf %3, %5 : vector<4x8xf32>
    %c0_6 = arith.constant 0 : index
    %c0_7 = arith.constant 0 : index
    %7 = vector.load %arg4[%c0_6, %c0_7] : memref<4x1xf32, #tpu.memory_space<vmem>>, vector<4x1xf32>
    %8 = vector.broadcast %7 : vector<4x1xf32> to vector<4x8xf32>
    %9 = arith.addf %6, %8 : vector<4x8xf32>
    %cst = arith.constant 0.000000e+00 : f32
    %10 = vector.broadcast %cst : f32 to vector<4x8xf32>
    %11 = arith.maximumf %9, %10 : vector<4x8xf32>
    %12 = vector.extract_strided_slice %1 {offsets = [4, 0], sizes = [4, 8], strides = [1, 1]} : vector<8x8xf32> to vector<4x8xf32>
    %c0_8 = arith.constant 0 : index
    %c0_9 = arith.constant 0 : index
    %13 = vector.load %arg3[%c0_8, %c0_9] : memref<4x1xf32, #tpu.memory_space<vmem>>, vector<4x1xf32>
    %14 = vector.broadcast %13 : vector<4x1xf32> to vector<4x8xf32>
    %15 = arith.mulf %12, %14 : vector<4x8xf32>
    %c0_10 = arith.constant 0 : index
    %c0_11 = arith.constant 0 : index
    %16 = vector.load %arg4[%c0_10, %c0_11] : memref<4x1xf32, #tpu.memory_space<vmem>>, vector<4x1xf32>
    %17 = vector.broadcast %16 : vector<4x1xf32> to vector<4x8xf32>
    %18 = arith.addf %15, %17 : vector<4x8xf32>
    %cst_12 = arith.constant 0.000000e+00 : f32
    %19 = vector.broadcast %cst_12 : f32 to vector<4x8xf32>
    %20 = arith.maximumf %18, %19 : vector<4x8xf32>
    %c0_13 = arith.constant 0 : index
    %c0_14 = arith.constant 0 : index
    %21 = vector.load %arg11[%c0_13, %c0_14] : memref<12x8xf32, #tpu.memory_space<vmem>>, vector<4x8xf32>
    tpu.vector_store %arg11[%c0_13, %c0_14], %11 {strides = array<i32>} : memref<12x8xf32, #tpu.memory_space<vmem>>, vector<4x8xf32>,
    %c4 = arith.constant 4 : index
    %c0_15 = arith.constant 0 : index
    %22 = vector.load %arg11[%c4, %c0_15] : memref<12x8xf32, #tpu.memory_space<vmem>>, vector<4x8xf32>
    tpu.vector_store %arg11[%c4, %c0_15], %20 {strides = array<i32>} : memref<12x8xf32, #tpu.memory_space<vmem>>, vector<4x8xf32>,
    %23 = vector.extract_strided_slice %11 {offsets = [0, 1], sizes = [4, 7], strides = [1, 1]} : vector<4x8xf32> to vector<4x7xf32>
    %24 = vector.extract_strided_slice %11 {offsets = [0, 0], sizes = [4, 1], strides = [1, 1]} : vector<4x8xf32> to vector<4x1xf32>
    %25 = tpu.concatenate %23, %24 in 1 : vector<4x7xf32>, vector<4x1xf32> -> vector<4x8xf32>
    %c0_i32 = arith.constant 0 : i32
    %26 = vector.broadcast %c0_i32 : i32 to vector<1x8xi32>
    %27 = arith.cmpi sge, %2, %26 : vector<1x8xi32>
    %c7_i32 = arith.constant 7 : i32
    %28 = vector.broadcast %c7_i32 : i32 to vector<1x8xi32>
    %29 = arith.cmpi slt, %2, %28 : vector<1x8xi32>
    %30 = arith.andi %27, %29 : vector<1x8xi1>
    %cst_16 = arith.constant 0.000000e+00 : f32
    %31 = vector.shape_cast %30 : vector<1x8xi1> to vector<1x8xi1>
    %32 = vector.broadcast %31 : vector<1x8xi1> to vector<4x8xi1>
    %33 = vector.broadcast %cst_16 : f32 to vector<4x8xf32>
    %34 = arith.select %32, %25, %33 : vector<4x8xi1>, vector<4x8xf32>
    %c8 = arith.constant 8 : index
    %c0_17 = arith.constant 0 : index
    %35 = vector.load %arg11[%c8, %c0_17] : memref<12x8xf32, #tpu.memory_space<vmem>>, vector<4x8xf32>
    tpu.vector_store %arg11[%c8, %c0_17], %34 {strides = array<i32>} : memref<12x8xf32, #tpu.memory_space<vmem>>, vector<4x8xf32>,
    %c0_18 = arith.constant 0 : index
    %c0_19 = arith.constant 0 : index
    %36 = vector.load %arg5[%c0_18, %c0_19] : memref<8x12xf32, #tpu.memory_space<vmem>>, vector<8x12xf32>
    %c0_20 = arith.constant 0 : index
    %c0_21 = arith.constant 0 : index
    %37 = vector.load %arg11[%c0_20, %c0_21] : memref<12x8xf32, #tpu.memory_space<vmem>>, vector<12x8xf32>
    %cst_22 = arith.constant dense<0.000000e+00> : vector<8x8xf32>
    %38 = tpu.matmul %36, %37, %cst_22 {dimension_numbers = #tpu.dot_dimension_numbers<[1], [0], [0], [1], [0, 0, 1, 1], [], []>} : vector<8x12xf32>, vector<12x8xf32>, vector<8x8xf32> -> vector<8x8xf32>
    %c0_23 = arith.constant 0 : index
    %c0_24 = arith.constant 0 : index
    %39 = vector.load %arg6[%c0_23, %c0_24] : memref<8x1xf32, #tpu.memory_space<vmem>>, vector<8x1xf32>
    %40 = vector.broadcast %39 : vector<8x1xf32> to vector<8x8xf32>
    %41 = arith.mulf %38, %40 : vector<8x8xf32>
    %c0_25 = arith.constant 0 : index
    %c0_26 = arith.constant 0 : index
    %42 = vector.load %arg7[%c0_25, %c0_26] : memref<8x1xf32, #tpu.memory_space<vmem>>, vector<8x1xf32>
    %43 = vector.broadcast %42 : vector<8x1xf32> to vector<8x8xf32>
    %44 = arith.addf %41, %43 : vector<8x8xf32>
    %cst_27 = arith.constant 0.000000e+00 : f32
    %45 = vector.broadcast %cst_27 : f32 to vector<8x8xf32>
    %46 = arith.maximumf %44, %45 : vector<8x8xf32>
    %47 = vector.extract_strided_slice %46 {offsets = [0, 7], sizes = [8, 1], strides = [1, 1]} : vector<8x8xf32> to vector<8x1xf32>
    %48 = vector.extract_strided_slice %46 {offsets = [0, 0], sizes = [8, 7], strides = [1, 1]} : vector<8x8xf32> to vector<8x7xf32>
    %49 = tpu.concatenate %47, %48 in 1 : vector<8x1xf32>, vector<8x7xf32> -> vector<8x8xf32>
    %c1_i32 = arith.constant 1 : i32
    %50 = vector.broadcast %c1_i32 : i32 to vector<1x8xi32>
    %51 = arith.cmpi sge, %2, %50 : vector<1x8xi32>
    %c8_i32 = arith.constant 8 : i32
    %52 = vector.broadcast %c8_i32 : i32 to vector<1x8xi32>
    %53 = arith.cmpi slt, %2, %52 : vector<1x8xi32>
    %54 = arith.andi %51, %53 : vector<1x8xi1>
    %cst_28 = arith.constant 0.000000e+00 : f32
    %55 = vector.shape_cast %54 : vector<1x8xi1> to vector<1x8xi1>
    %56 = vector.broadcast %55 : vector<1x8xi1> to vector<8x8xi1>
    %57 = vector.broadcast %cst_28 : f32 to vector<8x8xf32>
    %58 = arith.select %56, %49, %57 : vector<8x8xi1>, vector<8x8xf32>
    %c0_29 = arith.constant 0 : index
    %c0_30 = arith.constant 0 : index
    %59 = vector.load %arg12[%c0_29, %c0_30] : memref<24x8xf32, #tpu.memory_space<vmem>>, vector<8x8xf32>
    tpu.vector_store %arg12[%c0_29, %c0_30], %58 {strides = array<i32>} : memref<24x8xf32, #tpu.memory_space<vmem>>, vector<8x8xf32>,
    %c8_31 = arith.constant 8 : index
    %c0_32 = arith.constant 0 : index
    %60 = vector.load %arg12[%c8_31, %c0_32] : memref<24x8xf32, #tpu.memory_space<vmem>>, vector<8x8xf32>
    tpu.vector_store %arg12[%c8_31, %c0_32], %46 {strides = array<i32>} : memref<24x8xf32, #tpu.memory_space<vmem>>, vector<8x8xf32>,
    %61 = vector.extract_strided_slice %46 {offsets = [0, 1], sizes = [8, 7], strides = [1, 1]} : vector<8x8xf32> to vector<8x7xf32>
    %62 = vector.extract_strided_slice %46 {offsets = [0, 0], sizes = [8, 1], strides = [1, 1]} : vector<8x8xf32> to vector<8x1xf32>
    %63 = tpu.concatenate %61, %62 in 1 : vector<8x7xf32>, vector<8x1xf32> -> vector<8x8xf32>
    %c0_i32_33 = arith.constant 0 : i32
    %64 = vector.broadcast %c0_i32_33 : i32 to vector<1x8xi32>
    %65 = arith.cmpi sge, %2, %64 : vector<1x8xi32>
    %c7_i32_34 = arith.constant 7 : i32
    %66 = vector.broadcast %c7_i32_34 : i32 to vector<1x8xi32>
    %67 = arith.cmpi slt, %2, %66 : vector<1x8xi32>
    %68 = arith.andi %65, %67 : vector<1x8xi1>
    %cst_35 = arith.constant 0.000000e+00 : f32
    %69 = vector.shape_cast %68 : vector<1x8xi1> to vector<1x8xi1>
    %70 = vector.broadcast %69 : vector<1x8xi1> to vector<8x8xi1>
    %71 = vector.broadcast %cst_35 : f32 to vector<8x8xf32>
    %72 = arith.select %70, %63, %71 : vector<8x8xi1>, vector<8x8xf32>
    %c16 = arith.constant 16 : index
    %c0_36 = arith.constant 0 : index
    %73 = vector.load %arg12[%c16, %c0_36] : memref<24x8xf32, #tpu.memory_space<vmem>>, vector<8x8xf32>
    tpu.vector_store %arg12[%c16, %c0_36], %72 {strides = array<i32>} : memref<24x8xf32, #tpu.memory_space<vmem>>, vector<8x8xf32>,
    %c0_37 = arith.constant 0 : index
    %c0_38 = arith.constant 0 : index
    %74 = vector.load %arg8[%c0_37, %c0_38] : memref<8x24xf32, #tpu.memory_space<vmem>>, vector<8x24xf32>
    %c0_39 = arith.constant 0 : index
    %c0_40 = arith.constant 0 : index
    %75 = vector.load %arg12[%c0_39, %c0_40] : memref<24x8xf32, #tpu.memory_space<vmem>>, vector<24x8xf32>
    %cst_41 = arith.constant dense<0.000000e+00> : vector<8x8xf32>
    %76 = tpu.matmul %74, %75, %cst_41 {dimension_numbers = #tpu.dot_dimension_numbers<[1], [0], [0], [1], [0, 0, 1, 1], [], []>} : vector<8x24xf32>, vector<24x8xf32>, vector<8x8xf32> -> vector<8x8xf32>
    %c0_42 = arith.constant 0 : index
    %c0_43 = arith.constant 0 : index
    %77 = vector.load %arg9[%c0_42, %c0_43] : memref<8x1xf32, #tpu.memory_space<vmem>>, vector<8x1xf32>
    %78 = vector.broadcast %77 : vector<8x1xf32> to vector<8x8xf32>
    %79 = arith.addf %76, %78 : vector<8x8xf32>
    %80 = vector.extract_strided_slice %1 {offsets = [0, 0], sizes = [4, 8], strides = [1, 1]} : vector<8x8xf32> to vector<4x8xf32>
    %81 = vector.extract_strided_slice %1 {offsets = [4, 0], sizes = [4, 8], strides = [1, 1]} : vector<8x8xf32> to vector<4x8xf32>
    %82 = arith.maximumf %80, %81 : vector<4x8xf32>
    %83 = vector.extract_strided_slice %79 {offsets = [0, 0], sizes = [2, 8], strides = [1, 1]} : vector<8x8xf32> to vector<2x8xf32>
    %c0_44 = arith.constant 0 : index
    %c0_45 = arith.constant 0 : index
    %c0_46 = arith.constant 0 : index
    %84 = vector.load %arg10[%c0_44, %c0_45, %c0_46] : memref<1x8x8xf32, #tpu.memory_space<vmem>>, vector<1x2x8xf32>
    %85 = vector.shape_cast %84 : vector<1x2x8xf32> to vector<2x8xf32>
    %86 = vector.shape_cast %83 : vector<2x8xf32> to vector<1x2x8xf32>
    tpu.vector_store %arg10[%c0_44, %c0_45, %c0_46], %86 {strides = array<i32>} : memref<1x8x8xf32, #tpu.memory_space<vmem>>, vector<1x2x8xf32>,
    %87 = vector.extract_strided_slice %79 {offsets = [2, 0], sizes = [4, 8], strides = [1, 1]} : vector<8x8xf32> to vector<4x8xf32>
    %88 = arith.addf %87, %82 : vector<4x8xf32>
    %c0_47 = arith.constant 0 : index
    %c2 = arith.constant 2 : index
    %c0_48 = arith.constant 0 : index
    %89 = vector.load %arg10[%c0_47, %c2, %c0_48] : memref<1x8x8xf32, #tpu.memory_space<vmem>>, vector<1x4x8xf32>
    %90 = vector.shape_cast %89 : vector<1x4x8xf32> to vector<4x8xf32>
    %91 = vector.shape_cast %88 : vector<4x8xf32> to vector<1x4x8xf32>
    tpu.vector_store %arg10[%c0_47, %c2, %c0_48], %91 {strides = array<i32>} : memref<1x8x8xf32, #tpu.memory_space<vmem>>, vector<1x4x8xf32>,
    %92 = vector.extract_strided_slice %79 {offsets = [6, 0], sizes = [2, 8], strides = [1, 1]} : vector<8x8xf32> to vector<2x8xf32>
    %c0_49 = arith.constant 0 : index
    %c6 = arith.constant 6 : index
    %c0_50 = arith.constant 0 : index
    %93 = vector.load %arg10[%c0_49, %c6, %c0_50] : memref<1x8x8xf32, #tpu.memory_space<vmem>>, vector<1x2x8xf32>
    %94 = vector.shape_cast %93 : vector<1x2x8xf32> to vector<2x8xf32>
    %95 = vector.shape_cast %92 : vector<2x8xf32> to vector<1x2x8xf32>
    tpu.vector_store %arg10[%c0_49, %c6, %c0_50], %95 {strides = array<i32>} : memref<1x8x8xf32, #tpu.memory_space<vmem>>, vector<1x2x8xf32>,
    return
  }
  func.func @transform_0(%arg0: i32) -> (i32, i32, i32) {
    %c0_i32 = arith.constant 0 : i32
    %c0_i32_0 = arith.constant 0 : i32
    %c0_i32_1 = arith.constant 0 : i32
    return %arg0, %c0_i32, %c0_i32_0 : i32, i32, i32
  }
  func.func @transform_1(%arg0: i32) -> (i32, i32) {
    %c0_i32 = arith.constant 0 : i32
    %c0_i32_0 = arith.constant 0 : i32
    %c0_i32_1 = arith.constant 0 : i32
    return %c0_i32, %c0_i32_0 : i32, i32
  }
  func.func @transform_2(%arg0: i32) -> (i32, i32) {
    %c0_i32 = arith.constant 0 : i32
    %c0_i32_0 = arith.constant 0 : i32
    %c0_i32_1 = arith.constant 0 : i32
    return %c0_i32, %c0_i32_0 : i32, i32
  }
  func.func @transform_3(%arg0: i32) -> (i32, i32) {
    %c0_i32 = arith.constant 0 : i32
    %c0_i32_0 = arith.constant 0 : i32
    %c0_i32_1 = arith.constant 0 : i32
    return %c0_i32, %c0_i32_0 : i32, i32
  }
  func.func @transform_4(%arg0: i32) -> (i32, i32) {
    %c0_i32 = arith.constant 0 : i32
    %c0_i32_0 = arith.constant 0 : i32
    %c0_i32_1 = arith.constant 0 : i32
    return %c0_i32, %c0_i32_0 : i32, i32
  }
  func.func @transform_5(%arg0: i32) -> (i32, i32) {
    %c0_i32 = arith.constant 0 : i32
    %c0_i32_0 = arith.constant 0 : i32
    %c0_i32_1 = arith.constant 0 : i32
    return %c0_i32, %c0_i32_0 : i32, i32
  }
  func.func @transform_6(%arg0: i32) -> (i32, i32) {
    %c0_i32 = arith.constant 0 : i32
    %c0_i32_0 = arith.constant 0 : i32
    %c0_i32_1 = arith.constant 0 : i32
    return %c0_i32, %c0_i32_0 : i32, i32
  }
  func.func @transform_7(%arg0: i32) -> (i32, i32) {
    %c0_i32 = arith.constant 0 : i32
    %c0_i32_0 = arith.constant 0 : i32
    %c0_i32_1 = arith.constant 0 : i32
    return %c0_i32, %c0_i32_0 : i32, i32
  }
  func.func @transform_8(%arg0: i32) -> (i32, i32) {
    %c0_i32 = arith.constant 0 : i32
    %c0_i32_0 = arith.constant 0 : i32
    %c0_i32_1 = arith.constant 0 : i32
    return %c0_i32, %c0_i32_0 : i32, i32
  }
  func.func @transform_9(%arg0: i32) -> (i32, i32, i32) {
    %c0_i32 = arith.constant 0 : i32
    %c0_i32_0 = arith.constant 0 : i32
    %c0_i32_1 = arith.constant 0 : i32
    return %arg0, %c0_i32, %c0_i32_0 : i32, i32, i32
  }
}

</mosaic_0001>

<bundles_post_ra>
// kernel: tpu_custom_call.1
= control target key start
LH: loop header
LB: loop body
LE: loop exit
PB: predicated region body
PF: predicated region fallthrough
CT: control target
= control target key end

     0   :  { %14 = vsyncpa [#allocation5], 0  ;;  %s1041_s0 = inlined_call_operand.vmem [shape: f32[2,8,8], index: 0, kind: input, shape index: {}]   ;;  %s1042_s1 = inlined_call_operand.vmem [shape: s32[1,8], index: 1, kind: input, shape index: {}]   ;;  %s1043_s2 = inlined_call_operand.vmem [shape: f32[4,1], index: 2, kind: input, shape index: {}]   ;;  %s1044_s3 = inlined_call_operand.vmem [shape: f32[4,1], index: 3, kind: input, shape index: {}]   ;;  %s1045_s4 = inlined_call_operand.vmem [shape: f32[8,12], index: 4, kind: input, shape index: {}]   ;;  %s1046_s5 = inlined_call_operand.vmem [shape: f32[8,1], index: 5, kind: input, shape index: {}]   ;;  %s1047_s6 = inlined_call_operand.vmem [shape: f32[8,1], index: 6, kind: input, shape index: {}]   ;;  %s1048_s7 = inlined_call_operand.vmem [shape: f32[8,24], index: 7, kind: input, shape index: {}]   ;;  %s1049_s8 = inlined_call_operand.vmem [shape: f32[8,1], index: 8, kind: input, shape index: {}]   ;;  %s1050_s9 = inlined_call_operand.hbm [shape: f32[2,8,8], index: 9, kind: output, shape index: {}]  }
   0x1   :  { %16 = vsyncpa [#allocation5 + $0x1], 0  ;;  %s891_s30 = smov 0   ;;  %s893_s10 = smov 0  }
   0x2   :  { %s895_s11 = smov 0   ;;  %s897_s12 = smov 0  }
   0x3 LB: > { %s912_s13 = sadd.s32 4294967295, %s829_s12   ;;  %s674_s14 = sadd.s32 4294967294, %s829_s12   ;;  %s829_s12 = sphi %s897_s12, %s1056_s12   ;;  %s825_s11 = sphi %s895_s11, %s1055_s11   ;;  %s821_s10 = sphi %s893_s10, %s1054_s10   ;;  %s817_s30 = sphi %s891_s30, %s1053_s30  }
   0x4   : > { %s916_s15 = sadd.s32 1, %s829_s12   ;;  %s223_s16 = sadd.s32 1, %s825_s11 }
   0x5   : > { %s220_s17 = ssub.s32 %s829_s12, %s916_s15  ;;  %p233_p0 = scmp.ne.s32.totalorder %s825_s11, %s821_s10 }
   0x6   : > { %p221_p1 = scmp.eq.s32.totalorder %s220_s17, 0  ;;  %p234_p2 = scmp.eq.s32.totalorder %s912_s13, 1 }
   0x7   : > { %p239_p3 = scmp.ne.s32.totalorder %s821_s10, %s817_s30  ;;  %p240_p4 = scmp.eq.s32.totalorder %s674_s14, 1 }
   0x8   : > { %s927_s18 = scalar_select %p221_p1, %s825_s11, %s223_s16  }
   0x9   : > { %p929_p5 = por %p234_p2, %p233_p0  ;;  %p933_p6 = por %p240_p4, %p239_p3 }
   0xa   : > { %p677_p7 = scmp.ge.s32.totalorder %s829_s12, 1  ;;  %p289_p8 = scmp.lt.s32.totalorder %s829_s12, 3 }
   0xc   : > { %p290_p9 = pnand %p677_p7, %p289_p8 }
   0xd   : > { %v330_v0 = vld [vmem:[%s1043_s2] sm:$0xf] (!%p290_p9)  ;;  %v831_v1 = vmov (!%p290_p9), 0   ;;  %p324_p10 = scmp.lt.s32.totalorder (!%p290_p9), %s912_s13, 1  ;;  %v832_v8 = vmov (!%p290_p9), 0.0|0.0   ;;  %vm352_vm0 = vcmask (!%p290_p9), 60416   ;;  %v369_v19 = vlaneseq (!%p290_p9) }
   0xe   : > { %293 = sbr.rel (%p290_p9) target bundleno = 865 (0x361), region = 56  ;;  %765 = vset.pattern.permute.xlu0 (!%p290_p9), %v831_v1  ;;  %766 = vset.pattern.permute.xlu1 (!%p290_p9), %v831_v1  ;;  %v337_v2 = vld [vmem:[%s1044_s3] sm:$0xf] (!%p290_p9)  ;;  %vm354_vm1 = vcmask (!%p290_p9), 64516   ;;  %s833_s17 = smov (!%p290_p9), 127   ;;  %vm835_vm2 = vmmov (!%p290_p9), 0  }
   0xf   : > { %333 = vperm.xlu0 (!%p290_p9), %765, %v330_v0   ;;  %v457_v3 = vld [vmem:[%s1046_s5] sm:$0xff] (!%p290_p9)  ;;  %710 = vmatprep.subr.bf16.mxu0 (!%p290_p9), %v832_v8  ;;  %s834_s21 = smov (!%p290_p9), 7   ;;  %v836_v16 = vmov (!%p290_p9), 0.0   ;;  %v370_v20 = vshrl.u32 (!%p290_p9), %v369_v19, 7  ;;  %vm363_vm6 = vcmask (!%p290_p9), 56320   ;;  %vm383_vm8 = vcmask (!%p290_p9), 1043456  }
  0x10   : > { %714 = vmatprep.subr.bf16.mxu1 (!%p290_p9), %v832_v8  ;;  %698 = vmatprep.mubr.msk.f32.mxu0 (!%p290_p9), %vm835_vm2, %v836_v16  ;;  %v464_v17 = vld [vmem:[%s1047_s6] sm:$0xff] (!%p290_p9)  ;;  %vm837_vm9 = vmmov (!%p290_p9), 1   ;;  %vm379_vm11 = vcmask (!%p290_p9), 97280   ;;  %vm491_vm12 = vcmask (!%p290_p9), 64512   ;;  %s839_s29 = smov (!%p290_p9), 121   ;;  %s321_s22 = sand.u32 (!%p290_p9), 1, %s821_s10  }
  0x11   : > { %707 = vmatprep.mubr.msk.f32.mxu1 (!%p290_p9), %vm835_vm2, %v836_v16  ;;  %v329_v18 = vld [vmem:[%s1042_s1] sm:$0x1] (!%p290_p9)  ;;  %v371_v21 = vsub.s32 (!%p290_p9), 0, %v370_v20  ;;  %vm712_vm10 = vmpackc.low (!%p290_p9), %vm383_vm8, %vm837_vm9  ;;  %vm513_vm2 = vcmask (!%p290_p9), 195584   ;;  %s678_s23 = sshll.u32 (!%p290_p9), %s321_s22, 3  ;;  %s684_s24 = sshll.u32 (!%p290_p9), %s912_s13, 7 }
  0x12   : > { %vm365_vm3 = vcmp.ge.s32.totalorder (!%p290_p9), %v329_v18, 0  ;;  %vm366_vm4 = vcmp.lt.s32.totalorder (!%p290_p9), %v329_v18, 7  ;;  %v376_v31 = vld [vmem:[%s1045_s4] sm:$0xff] (!%p290_p9)  ;;  %vm481_vm13 = vcmp.ge.s32.totalorder (!%p290_p9), %v329_v18, 1  ;;  %vm482_vm14 = vcmp.lt.s32.totalorder (!%p290_p9), %v329_v18, 8  ;;  %s323_s25 = scalar_lea.vmem (!%p290_p9), [#allocation4], %s678_s23 }
  0x13   : > { %340 = vperm.xlu0 (!%p290_p9), %765, %v337_v2   ;;  %vm367_vm5 = vmand (!%p290_p9), %vm365_vm3, %vm366_vm4  ;;  %v507_v39 = vld [vmem:[%s1049_s8] sm:$0xff] (!%p290_p9)  ;;  %vm591_vm3 = vcmask (!%p290_p9), 58368   ;;  %vm599_vm4 = vcmask (!%p290_p9), 64518   ;;  %s615_s26 = sshll.u32 (!%p290_p9), %s323_s25, 4  ;;  %s1001_s26 = int_to_ptr.vmem [resolvable:$true] %s615_s26 }
  0x14   : > { %v368_v22 = vsel (!%p290_p9), %vm367_vm5, 1, %v831_v1  ;;  %vm483_vm15 = vmand (!%p290_p9), %vm481_vm13, %vm482_vm14  ;;  %v503_v53 = vld [vmem:[%s1048_s7] sm:$0xff] (!%p290_p9)  ;;  %vm597_vm5 = vcmask (!%p290_p9), 62466   ;;  %s767_s14 = scalar_lea.vmem (!%p290_p9), %s1001_s26, 128 }
  0x15   : > { %s325_s27 = scalar_select %p324_p10, %s912_s13, 1  ;;  %v372_v23 = vrot.slane %v368_v22, %v371_v21  ;;  %v484_v40 = vsel %vm483_vm15, 1, %v831_v1 }
  0x16   : > { %v488_v41 = vrot.slane %v484_v40, %v371_v21  ;;  %s602_s13 = scalar_lea.sflag [#allocation5], %s321_s22  ;;  %p768_p11 = scmp.ne.s32.totalorder %s1001_s26, %s767_s14 }
  0x17   : > { %460 = vperm.xlu0 %765, %v457_v3   ;;  %s679_s28 = sshll.u32 %s325_s27, 3  ;;  %vm373_vm7 = vcmp.eq.s32.totalorder %v372_v23, 1 }
  0x18   : > { %s327_s16 = scalar_lea.vmem %s1041_s0, %s679_s28  ;;  %s838_s28 = smov 1  }
  0x19   : > { %v955_v5 = vld [vmem:[%s327_s16] sm:$0xff]  ;;  %p769_p12 = pnand %p768_p11, %p929_p5  ;;  %s840_s16 = smov [#allocation4]  }
  0x1a   : > { %v588_v55 = vrot.slane %v955_v5, 4 }
  0x1b   : > { %p770_p13 = pneg %p769_p12 }
  0x1c   : > { %v590_v56 = vmax.f32 %v955_v5, %v588_v55 }
  0x1e   : > { %v594_v57 = vrot.slane %v590_v56, 6 }
  0x8e   : > { %v334_v4 = vpop.permute.xlu0 %333 }
  0x8f   : > { %v345_v6 = vrot.slane %v334_v4, 4  ;;  %v336_v7 = vmul.f32 %v334_v4, %v955_v5 }
  0x91   : > { %v347_v10 = vmul.f32 %v345_v6, %v955_v5 }
  0x92   : > { %v341_v9 = vpop.permute.xlu0 %340 }
  0x93   : > { %v343_v11 = vadd.f32 %v341_v9, %v336_v7  ;;  %v348_v12 = vrot.slane %v341_v9, 4 }
  0x95   : > { %v344_v13 = vmax.f32 %v343_v11, 0.0  ;;  %v350_v14 = vadd.f32 %v348_v12, %v347_v10 }
  0x96   : > { %v461_v32 = vpop.permute.xlu0 %460 }
  0x97   : > { %v351_v15 = vmax.f32 %v350_v14, 0.0  ;;  %357 = vrot.lane.b32.xlu1 %v344_v13, %s833_s17  ;;  %353 = vst.msk [vmem:[#allocation2] sm:$0xf] %vm352_vm0, %v344_v13 }
  0x99   : > { %355 = vst.msk [vmem:[#allocation2] sm:$0xf0] %vm354_vm1, %v351_v15  ;;  %vm489_vm1 = vcmp.eq.s32.totalorder %v488_v41, 1 }
  0x9b   : > { %360 = vrot.lane.b32.xlu1 %v344_v13, %s834_s21 }
  0x9f   : > { %467 = vperm.xlu1 %766, %v464_v17  }
  0xa0   : > { %v377_v28 = vld [vmem:[#allocation2] sm:$0xff] }
 0x109   : > { %v358_v24 = vpop.permute.xlu1 %357 }
 0x10d   : > { %v361_v25 = vpop.permute.xlu1 %360 }
 0x10e   : > { %v364_v26 = vsel %vm363_vm6, %v358_v24, %v361_v25 }
 0x10f   : > { %v374_v27 = vsel %vm373_vm7, %v364_v26, 0.0 }
 0x110   : > { %375 = vst.msk [vmem:[#allocation2 + $0x8] sm:$0xf] %vm352_vm0, %v374_v27  ;;  %vm479_vm0 = vcmask 7168  }
 0x117   : > { %v378_v29 = vld [vmem:[#allocation2 + $0x8] sm:$0xf] }
 0x118   : > { %v711_v30 = vpack.c.bf16 %v378_v29, %v377_v28 }
 0x11a   : > { %713 = vmatpush3.bf16.msk.msra.mxu0 %vm712_vm10, %v711_v30 }
 0x11d   : > { %699 = vmatmul.mubr.msk.f32.vlgmr.msra.gmra.mrb[0].mxu0 %vm379_vm11, %v376_v31 }
 0x11e   : > { %v468_v34 = vpop.permute.xlu1 %467 }
 0x1f0   : > { %v453_v33 = vpop.f32.mrb[0].mxu0 }
 0x1f1   : > { %v463_v35 = vmul.f32 %v461_v32, %v453_v33  ;;  %v700_v36 = vpop.f32.mrb[1].mxu0 }
 0x1f3   : > { %v470_v37 = vadd.f32 %v468_v34, %v463_v35 }
 0x1f5   : > { %v471_v38 = vmax.f32 %v470_v37, 0.0 }
 0x1f7   : > { %476 = vrot.lane.b32.xlu1 %v471_v38, %s838_s28  ;;  %473 = vrot.lane.b32.xlu0 %v471_v38, %s839_s29  ;;  %493 = vst.msk [vmem:[#allocation3 + $0x8] sm:$0xff] %vm491_vm12, %v471_v38  ;;  %s999_s29 = scalar_lea.hbm %s1050_s9, %s684_s24 }
 0x1fb   : > { %497 = vrot.lane.b32.xlu1 %v471_v38, %s834_s21  ;;  %494 = vrot.lane.b32.xlu0 %v471_v38, %s833_s17  ;;  %s771_s17 = sshll.u32 %s840_s16, 4  ;;  %s772_s17 = int_to_ptr.vmem [resolvable:$false] %s771_s17 }
 0x1fc   : > { %s773_s21 = scalar_lea.vmem %s772_s17, 256  ;;  %p774_p0 = scmp.lt.s32.totalorder %s1001_s26, %s772_s17 }
 0x1fd   : > { %p775_p1 = scmp.lt.s32.totalorder %s773_s21, %s767_s14 }
 0x1fe   : > { %v505_v51 = vld [vmem:[#allocation3 + $0x8] sm:$0xff] }
 0x1ff   : > { %510 = vperm.xlu0 %765, %v507_v39   ;;  %p776_p2 = por %p775_p1, %p774_p0 }
 0x201   : > { %p777_p3 = pnand %p776_p2, %p770_p13 }
 0x269   : > { %v477_v42 = vpop.permute.xlu1 %476  ;;  %v474_v43 = vpop.permute.xlu0 %473 }
 0x26a   : > { %v480_v44 = vsel %vm479_vm0, %v474_v43, %v477_v42 }
 0x26b   : > { %v490_v45 = vsel %vm489_vm1, %v480_v44, 0.0 }
 0x26c   : > { %492 = vst.msk [vmem:[#allocation3] sm:$0xff] %vm491_vm12, %v490_v45 }
 0x26d   : > { %v498_v46 = vpop.permute.xlu1 %497  ;;  %v495_v47 = vpop.permute.xlu0 %494 }
 0x26e   : > { %v500_v48 = vsel %vm363_vm6, %v495_v47, %v498_v46 }
 0x26f   : > { %v501_v49 = vsel %vm373_vm7, %v500_v48, 0.0 }
 0x270   : > { %502 = vst.msk [vmem:[#allocation3 + $0x10] sm:$0xff] %vm491_vm12, %v501_v49 }
 0x273   : > { %v504_v50 = vld [vmem:[#allocation3] sm:$0xff] }
 0x274   : > { %v715_v52 = vpack.c.bf16 %v505_v51, %v504_v50 }
 0x276   : > { %716 = vmatpush3.bf16.msra.mxu1 %v715_v52 }
 0x277   : > { %705 = vmatprep.subr.mxu1 %v836_v16  ;;  %v506_v54 = vld [vmem:[#allocation3 + $0x10] sm:$0xff] }
 0x27a   : > { %706 = vmatpush3.msra.mxu1 %v506_v54 }
 0x27b   : > { %708 = vmatmul.mubr.msk.f32.vlgmr.msra.gmra.mrb[0].mxu1 %vm513_vm2, %v503_v53 }
 0x27e   : > { %v511_v58 = vpop.permute.xlu0 %510 }
 0x34e   : > { %v583_v59 = vpop.f32.mrb[0].mxu1 }
 0x34f   : > { %v584_v60 = vadd.f32 %v583_v59, %v511_v58  ;;  %v709_v61 = vpop.f32.mrb[1].mxu1 }
 0x351   : > { %592 = vst.msk [vmem:[%s323_s25] sm:$0x3] %vm591_vm3, %v584_v60  ;;  %v596_v62 = vadd.f32 %v594_v57, %v584_v60 }
 0x352   : > { %600 = vst.msk [vmem:[%s323_s25] sm:$0xc0] %vm599_vm4, %v584_v60 }
 0x353   : > { %598 = vst.msk [vmem:[%s323_s25] sm:$0x3c] %vm597_vm5, %v596_v62 }
 0x354   : > { %780 = shalt.err (!%p777_p3)
}
 0x355   : > { %s781_s22 = scalar_lea.hbm %s999_s29, 128  ;;  %s785_s25 = scalar_lea.hbm %s1050_s9, 256 }
 0x356   : > { %p782_p4 = scmp.ne.s32.totalorder %s999_s29, %s781_s22  ;;  %p786_p9 = scmp.lt.u32.totalorder %s999_s29, %s1050_s9 }
 0x357   : > { %p787_p10 = scmp.lt.u32.totalorder %s785_s25, %s781_s22  ;;  %p789_p12 = scmp.lt.u32.totalorder %s781_s22, %s999_s29 }
 0x358   : > { %p783_p7 = pnand %p782_p4, %p929_p5 }
 0x359   : > { %p788_p11 = por %p787_p10, %p786_p9 }
 0x35a   : > { %p784_p8 = pneg %p783_p7 }
 0x35b   : > { %p790_p13 = por %p789_p12, %p788_p11 }
 0x35d   : > { %p791_p0 = pnand %p790_p13, %p784_p8 }
 0x35f   : > { %794 = shalt.err (!%p791_p0)
}
 0x360   : > { %717 = dma.vmem_to_hbm [thread:$0]  (%p929_p5), %s1001_s26, 128, %s999_s29, %s602_s13  }
 0x361 PF: > { %p723_p1 = scmp.ge.s32.totalorder %s829_s12, 2  ;;  %s627_s14 = sand.u32 1, %s817_s30  }
 0x362   : > { %s628_s16 = scalar_lea.sflag [#allocation5], %s627_s14 }
 0x363   : > { %p720_p2 = pnand %p723_p1, %p933_p6 }
 0x365   : > { %812 = dma.done.wait (!%p720_p2), %s628_s16, 128  }
 0x366   : > { %814 = vsyncadd (!%p720_p2), %s628_s16, 4294967168  ;;  %p19_p3 = scmp.ge.s32.totalorder %s916_s15, 4   ;;  %s1053_s30 = smov %s821_s10 }
 0x367   : > { %s1054_s10 = smov %s825_s11  ;;  %s1055_s11 = smov %s927_s18 }
 0x368   : > { %s1056_s12 = smov %s916_s15  ;;  %21 = sbr.rel (!%p19_p3) target bundleno = 3 (0x3), region = 91 }
 0x36f   :  { %633 = vsyncpa [#allocation5], 1 }
 0x370   :  { %635 = vsyncpa [#allocation5 + $0x1], 1 }

</bundles_post_ra>
